<compile_context>
chip_gen: v7x
topology: tpu7x:2x2x1
jax: 0.10.0
libtpu: 0.0.40
codegen_flags: <defaults>
</compile_context>

<pallas_src>
from functools import lru_cache, partial

import jax
import jax.numpy as jnp
from jax.experimental import pallas as pl
from jax.experimental.pallas import tpu as pltpu


def _round_up(x: int, m: int) -> int:
    return ((x + m - 1) // m) * m


# ----------------------------------------------------------------------------
# Kernel
# ----------------------------------------------------------------------------
def _make_gcn_decoder_kernel(inv_num_nodes: float):
    """Fused 2-layer GCN on a fully-connected graph, one output row per graph."""

    def kernel(x_ref, w1_ref, b1_ref, w2_ref, b2_ref, out_ref):
        # x_ref block: [Bt, m, c_in]  -- a tile of graphs per grid step.
        # A_hat = ones/n  =>  aggregation == column-mean over num_nodes rows;
        # the implicit zero-padded node rows add nothing to the sum.
        mean_x = jnp.sum(x_ref[...], axis=1) * inv_num_nodes           # [Bt, c_in]

        # layer 1: relu(mean_x @ W1 + b1)   (MXU M dimension = Bt graphs)
        h = jnp.dot(mean_x, w1_ref[...],
                    preferred_element_type=jnp.float32) + b1_ref[...]
        h = jnp.maximum(h, 0.0)                                        # [Bt, hidden]

        # layer 2: relu(h @ W2 + b2)   (mean of identical rows == the row)
        y = jnp.dot(h, w2_ref[...],
                    preferred_element_type=jnp.float32) + b2_ref[...]
        out_ref[...] = jnp.maximum(y, 0.0)                             # [Bt, oc_pad]

    return kernel


# ----------------------------------------------------------------------------
# Wrappers
# ----------------------------------------------------------------------------
@partial(jax.jit, static_argnums=(1,))
def graph_decoder_node_forward(x_batch, num_nodes, params):
    """Batched node-feature forward: x_batch [B, m, C_in] -> [B, num_nodes, C_out]."""
    w1, b1, w2, b2 = params
    B, m, c_in = x_batch.shape
    if m > num_nodes:
        raise ValueError(f"x has {m} nodes but num_nodes={num_nodes}")
    hidden = w1.shape[1]
    out_channels = w2.shape[1]
    oc_pad = _round_up(out_channels, 128)        # lane-dense kernel output width

    # Grid: 2 "parallel" steps when there is enough batch to feed both v7x
    # TensorCores; otherwise a single step (v5e / v6e are single-TC anyway).
    if B >= 16:
        num_steps = 2
        B_pad = _round_up(B, 2 * 8)              # each half a multiple of 8 sublanes
    else:
        num_steps = 1
        B_pad = _round_up(B, 8)                  # unmasked stores / full-vreg reduce
    Bt = B_pad // num_steps

    # NOTE: no padding of the node dimension (zeros are a no-op for the sum);
    # only the batch dim is rounded up to a sublane multiple.
    x_b = x_batch if B_pad == B else jnp.pad(
        x_batch, ((0, B_pad - B), (0, 0), (0, 0)))

    # pad final-layer weight/bias columns to a multiple of 128 lanes
    w2p = jnp.pad(w2, ((0, 0), (0, oc_pad - out_channels)))
    b2p = jnp.pad(b2, ((0, 0), (0, oc_pad - out_channels)))

    kernel = _make_gcn_decoder_kernel(1.0 / num_nodes)

    rows = pl.pallas_call(
        kernel,
        out_shape=jax.ShapeDtypeStruct((B_pad, oc_pad), jnp.float32),
        grid=(num_steps,),
        in_specs=[
            pl.BlockSpec((Bt, m, c_in), lambda b: (b, 0, 0)),
            pl.BlockSpec((c_in, hidden), lambda b: (0, 0)),
            pl.BlockSpec((1, hidden), lambda b: (0, 0)),
            pl.BlockSpec((hidden, oc_pad), lambda b: (0, 0)),
            pl.BlockSpec((1, oc_pad), lambda b: (0, 0)),
        ],
        out_specs=pl.BlockSpec((Bt, oc_pad), lambda b: (b, 0)),
        compiler_params=pltpu.CompilerParams(
            dimension_semantics=("parallel",)),   # megacore sharding on v7x
    )(x_b, w1, b1, w2p, b2p)

    # Broadcast the single row per graph to num_nodes rows and drop lane/batch
    # padding OUTSIDE the kernel (cheap XLA ops that fuse into consumers).
    rows = rows[:B, :out_channels]                                # [B, C_out]
    return jnp.broadcast_to(rows[:, None, :], (B, num_nodes, out_channels))


@lru_cache(maxsize=None)
def fully_connected_edges(num_nodes: int):
    """edge_index / edge_attr for a fully-connected graph (no self-loops).

    Built once per num_nodes with arange arithmetic; ordering matches the
    module's torch.meshgrid + (ii != jj) row-major mask.
    """
    n = num_nodes
    e = jnp.arange(n * (n - 1), dtype=jnp.int32)
    src = e // (n - 1)
    r = e % (n - 1)
    dst = r + (r >= src).astype(jnp.int32)
    edge_index = jnp.stack([src, dst], axis=0)                    # [2, n*(n-1)]
    edge_attr = jnp.zeros((n * (n - 1), 1), jnp.float32)          # [E, 1]
    return edge_index, edge_attr


def graph_decoder_forward(x, num_nodes, params):
    """Single-graph forward reproducing GraphDecoder.forward.

    Returns (node_x, edge_index, edge_attr), matching Data(x=..., edge_index=...,
    edge_attr=...) from the PyTorch module.
    """
    if x.shape[0] > num_nodes:
        raise ValueError(f"x has {x.shape[0]} nodes but num_nodes={num_nodes}")
    node_x = graph_decoder_node_forward(x[None], num_nodes, params)[0]
    edge_index, edge_attr = fully_connected_edges(num_nodes)
    return node_x, edge_index, edge_attr


# ----------------------------------------------------------------------------
# Parameters + pure-JAX reference (original dense GCN math) for validation
# ----------------------------------------------------------------------------
def init_params(key, codebook_dim, hidden_dim, out_channels):
    """Deterministic synthetic parameters; weights stored as [in, out]."""
    k1, k2, k3, k4 = jax.random.split(key, 4)
    w1 = jax.random.normal(k1, (codebook_dim, hidden_dim), jnp.float32) * 0.1
    b1 = jax.random.normal(k2, (1, hidden_dim), jnp.float32) * 0.1
    w2 = jax.random.normal(k3, (hidden_dim, out_channels), jnp.float32) * 0.1
    b2 = jax.random.normal(k4, (1, out_channels), jnp.float32) * 0.1
    return w1, b1, w2, b2


def reference_forward(x, num_nodes, params):
    """Dense reference: explicit A_hat = D^-1/2 (A+I) D^-1/2 and two GCN layers."""
    w1, b1, w2, b2 = params
    missing = num_nodes - x.shape[0]
    xp = jnp.concatenate([x, jnp.zeros((missing, x.shape[1]), x.dtype)], axis=0)
    a = jnp.ones((num_nodes, num_nodes), jnp.float32)   # (A without self-loops) + I
    deg = a.sum(axis=1)
    dinv = 1.0 / jnp.sqrt(deg)
    a_hat = dinv[:, None] * a * dinv[None, :]
    h = jnp.maximum(a_hat @ (xp @ w1) + b1, 0.0)
    h2 = jnp.maximum(a_hat @ (h @ w2) + b2, 0.0)
    return h2


# ----------------------------------------------------------------------------
# Demo / sanity checks
# ----------------------------------------------------------------------------
if __name__ == "__main__":
    codebook_dim = 32
    hidden_dim = 64
    out_channels = 1
    num_input_nodes = 6
    num_nodes = 8

    key = jax.random.PRNGKey(0)
    kx, kb, kc, kp = jax.random.split(key, 4)
    x = jax.random.normal(kx, (num_input_nodes, codebook_dim), jnp.float32)
    params = init_params(kp, codebook_dim, hidden_dim, out_channels)

    # --- single-graph forward (module semantics) ---------------------------
    node_x, edge_index, edge_attr = graph_decoder_forward(x, num_nodes, params)
    node_x = jax.block_until_ready(node_x)
    edge_index = jax.block_until_ready(edge_index)
    edge_attr = jax.block_until_ready(edge_attr)

    ref = reference_forward(x, num_nodes, params)
    assert node_x.shape == (num_nodes, out_channels)
    assert edge_index.shape == (2, num_nodes * (num_nodes - 1))
    assert edge_attr.shape == (num_nodes * (num_nodes - 1), 1)
    assert jnp.allclose(node_x, ref, atol=1e-5, rtol=1e-4)

    # edge_index matches the original meshgrid + boolean-mask construction
    i = jnp.arange(num_nodes)
    ii, jj = jnp.meshgrid(i, i, indexing="ij")
    mask = ii != jj
    assert jnp.array_equal(edge_index, jnp.stack([ii[mask], jj[mask]], axis=0))

    # --- small batched forward (single grid step) ---------------------------
    B = 4
    xb = jax.random.normal(kb, (B, num_input_nodes, codebook_dim), jnp.float32)
    nodes_b = jax.block_until_ready(
        graph_decoder_node_forward(xb, num_nodes, params))
    assert nodes_b.shape == (B, num_nodes, out_channels)
    for bi in range(B):
        refb = reference_forward(xb[bi], num_nodes, params)
        assert jnp.allclose(nodes_b[bi], refb, atol=1e-5, rtol=1e-4)

    # --- larger batched forward (2-way "parallel" grid, v7x both-TC path) ---
    B2 = 20
    xc = jax.random.normal(kc, (B2, num_input_nodes, codebook_dim), jnp.float32)
    nodes_c = jax.block_until_ready(
        graph_decoder_node_forward(xc, num_nodes, params))
    assert nodes_c.shape == (B2, num_nodes, out_channels)
    for bi in range(0, B2, 5):
        refc = reference_forward(xc[bi], num_nodes, params)
        assert jnp.allclose(nodes_c[bi], refc, atol=1e-5, rtol=1e-4)

    print("KERNEL_OK")
</pallas_src>

<mosaic_0001>
module attributes {stable_mosaic.version = 11 : i64} {
  func.func @kernel(%arg0: i32, %arg1: memref<8x6x32xf32, #tpu.memory_space<vmem>>, %arg2: memref<32x64xf32, #tpu.memory_space<vmem>>, %arg3: memref<1x64xf32, #tpu.memory_space<vmem>>, %arg4: memref<64x128xf32, #tpu.memory_space<vmem>>, %arg5: memref<1x128xf32, #tpu.memory_space<vmem>>, %arg6: memref<8x128xf32, #tpu.memory_space<vmem>>) attributes {dimension_semantics = [#tpu.dimension_semantics<parallel>], iteration_bounds = array<i64: 1>, scalar_prefetch = 0 : i64, scratch_operands = 0 : i64, tpu.core_type = #tpu.core_type<tc>, window_params = [{transform_indices = @transform_0, window_bounds = array<i64: 8, 6, 32>}, {pipeline_mode = #tpu.pipeline_mode<synchronous>, transform_indices = @transform_1, window_bounds = array<i64: 32, 64>}, {pipeline_mode = #tpu.pipeline_mode<synchronous>, transform_indices = @transform_2, window_bounds = array<i64: 1, 64>}, {pipeline_mode = #tpu.pipeline_mode<synchronous>, transform_indices = @transform_3, window_bounds = array<i64: 64, 128>}, {pipeline_mode = #tpu.pipeline_mode<synchronous>, transform_indices = @transform_4, window_bounds = array<i64: 1, 128>}, {transform_indices = @transform_5, window_bounds = array<i64: 8, 128>}]} {
    %c0 = arith.constant 0 : index
    %c0_0 = arith.constant 0 : index
    %c0_1 = arith.constant 0 : index
    %0 = vector.load %arg1[%c0, %c0_0, %c0_1] : memref<8x6x32xf32, #tpu.memory_space<vmem>>, vector<8x6x32xf32>
    %cst = arith.constant dense<0.000000e+00> : vector<8x32xf32>
    %1 = vector.multi_reduction <add>, %0, %cst [1] : vector<8x6x32xf32> to vector<8x32xf32>
    %cst_2 = arith.constant 1.250000e-01 : f32
    %2 = vector.broadcast %cst_2 : f32 to vector<8x32xf32>
    %3 = arith.mulf %1, %2 : vector<8x32xf32>
    %c0_3 = arith.constant 0 : index
    %c0_4 = arith.constant 0 : index
    %4 = vector.load %arg2[%c0_3, %c0_4] : memref<32x64xf32, #tpu.memory_space<vmem>>, vector<32x64xf32>
    %cst_5 = arith.constant dense<0.000000e+00> : vector<8x64xf32>
    %5 = tpu.matmul %3, %4, %cst_5 {dimension_numbers = #tpu.dot_dimension_numbers<[1], [0], [0], [1], [0, 0, 1, 1], [], []>} : vector<8x32xf32>, vector<32x64xf32>, vector<8x64xf32> -> vector<8x64xf32>
    %c0_6 = arith.constant 0 : index
    %c0_7 = arith.constant 0 : index
    %6 = vector.load %arg3[%c0_6, %c0_7] : memref<1x64xf32, #tpu.memory_space<vmem>>, vector<1x64xf32>
    %7 = vector.broadcast %6 : vector<1x64xf32> to vector<8x64xf32>
    %8 = arith.addf %5, %7 : vector<8x64xf32>
    %cst_8 = arith.constant 0.000000e+00 : f32
    %9 = vector.broadcast %cst_8 : f32 to vector<8x64xf32>
    %10 = arith.maximumf %8, %9 : vector<8x64xf32>
    %c0_9 = arith.constant 0 : index
    %c0_10 = arith.constant 0 : index
    %11 = vector.load %arg4[%c0_9, %c0_10] : memref<64x128xf32, #tpu.memory_space<vmem>>, vector<64x128xf32>
    %cst_11 = arith.constant dense<0.000000e+00> : vector<8x128xf32>
    %12 = tpu.matmul %10, %11, %cst_11 {dimension_numbers = #tpu.dot_dimension_numbers<[1], [0], [0], [1], [0, 0, 1, 1], [], []>} : vector<8x64xf32>, vector<64x128xf32>, vector<8x128xf32> -> vector<8x128xf32>
    %c0_12 = arith.constant 0 : index
    %c0_13 = arith.constant 0 : index
    %13 = vector.load %arg5[%c0_12, %c0_13] : memref<1x128xf32, #tpu.memory_space<vmem>>, vector<1x128xf32>
    %14 = vector.broadcast %13 : vector<1x128xf32> to vector<8x128xf32>
    %15 = arith.addf %12, %14 : vector<8x128xf32>
    %cst_14 = arith.constant 0.000000e+00 : f32
    %16 = vector.broadcast %cst_14 : f32 to vector<8x128xf32>
    %17 = arith.maximumf %15, %16 : vector<8x128xf32>
    %c0_15 = arith.constant 0 : index
    %c0_16 = arith.constant 0 : index
    %18 = vector.load %arg6[%c0_15, %c0_16] : memref<8x128xf32, #tpu.memory_space<vmem>>, vector<8x128xf32>
    tpu.vector_store %arg6[%c0_15, %c0_16], %17 {strides = array<i32>} : memref<8x128xf32, #tpu.memory_space<vmem>>, vector<8x128xf32>,
    return
  }
  func.func @transform_0(%arg0: i32) -> (i32, i32, i32) {
    %c0_i32 = arith.constant 0 : i32
    %c0_i32_0 = arith.constant 0 : i32
    %c0_i32_1 = arith.constant 0 : i32
    return %arg0, %c0_i32, %c0_i32_0 : i32, i32, i32
  }
  func.func @transform_1(%arg0: i32) -> (i32, i32) {
    %c0_i32 = arith.constant 0 : i32
    %c0_i32_0 = arith.constant 0 : i32
    %c0_i32_1 = arith.constant 0 : i32
    return %c0_i32, %c0_i32_0 : i32, i32
  }
  func.func @transform_2(%arg0: i32) -> (i32, i32) {
    %c0_i32 = arith.constant 0 : i32
    %c0_i32_0 = arith.constant 0 : i32
    %c0_i32_1 = arith.constant 0 : i32
    return %c0_i32, %c0_i32_0 : i32, i32
  }
  func.func @transform_3(%arg0: i32) -> (i32, i32) {
    %c0_i32 = arith.constant 0 : i32
    %c0_i32_0 = arith.constant 0 : i32
    %c0_i32_1 = arith.constant 0 : i32
    return %c0_i32, %c0_i32_0 : i32, i32
  }
  func.func @transform_4(%arg0: i32) -> (i32, i32) {
    %c0_i32 = arith.constant 0 : i32
    %c0_i32_0 = arith.constant 0 : i32
    %c0_i32_1 = arith.constant 0 : i32
    return %c0_i32, %c0_i32_0 : i32, i32
  }
  func.func @transform_5(%arg0: i32) -> (i32, i32) {
    %c0_i32 = arith.constant 0 : i32
    %c0_i32_0 = arith.constant 0 : i32
    return %arg0, %c0_i32 : i32, i32
  }
}

</mosaic_0001>

<bundles_post_ra>
// kernel: graph_decoder_node_forward.1
= control target key start
LH: loop header
LB: loop body
LE: loop exit
PB: predicated region body
PF: predicated region fallthrough
CT: control target
= control target key end

     0   :  { %v364_v0 = vmov 0.0|0.0   ;;  %vm365_vm0 = vmmov 0   ;;  %v366_v4 = vmov 0.0   ;;  %vm28_vm1 = vcmask 259072   ;;  %s482_s1 = inlined_call_operand.vmem [shape: f32[32,64], index: 1, kind: input, shape index: {}]   ;;  %s483_s0 = inlined_call_operand.vmem [shape: f32[8,6,32], index: 0, kind: input, shape index: {}]   ;;  %s484_s3 = inlined_call_operand.vmem [shape: f32[64,128], index: 3, kind: input, shape index: {}]   ;;  %s485_s2 = inlined_call_operand.vmem [shape: f32[1,64], index: 2, kind: input, shape index: {}]   ;;  %s486_s4 = inlined_call_operand.vmem [shape: f32[1,128], index: 4, kind: input, shape index: {}]   ;;  %s487_s5 = inlined_call_operand.vmem [shape: f32[8,128], index: 5, kind: output, shape index: {}]  }
   0x1   :  { %343 = vmatprep.subr.bf16.mxu0 %v364_v0  ;;  %v93_v1 = vld [vmem:[%s482_s1] sm:$0xff]  ;;  %v94_v2 = vld [vmem:[%s482_s1 + $0x8] sm:$0xff]  ;;  %v95_v3 = vld [vmem:[%s482_s1 + $0x10] sm:$0xff]  ;;  %321 = vmatprep.mubr.msk.f32.mxu0 %vm365_vm0, %v366_v4  ;;  %vm112_vm2 = vcmask 1041409   ;;  %vm114_vm3 = vcmask 1042434   ;;  %vm116_vm4 = vcmask 1043459  }
   0x2   :  { %v344_v5 = vpack.c.bf16 %v94_v2, %v93_v1  ;;  %v96_v6 = vld [vmem:[%s482_s1 + $0x18] sm:$0xff]  ;;  %v20_v7 = vld [vmem:[%s483_s0] sm:$0x3f]  ;;  %v21_v8 = vld [vmem:[%s483_s0 + $0x8] sm:$0x3f]  ;;  %349 = vmatprep.subr.bf16.mxu1 %v364_v0  ;;  %340 = vmatprep.mubr.msk.f32.mxu1 %vm365_vm0, %v366_v4  ;;  %vm118_vm5 = vcmask 1044484  }
   0x3   :  { %v22_v9 = vld [vmem:[%s483_s0 + $0x10] sm:$0x3f]  ;;  %v23_v10 = vld [vmem:[%s483_s0 + $0x18] sm:$0x3f]  ;;  %v24_v11 = vld [vmem:[%s483_s0 + $0x20] sm:$0x3f]  ;;  %v347_v12 = vpack.c.bf16 %v96_v6, %v95_v3 }
   0x4   :  { %345 = vmatpush3.bf16.msra.mxu0 %v344_v5  ;;  %v25_v13 = vld [vmem:[%s483_s0 + $0x28] sm:$0x3f]  ;;  %v26_v14 = vld [vmem:[%s483_s0 + $0x30] sm:$0x3f]  ;;  %v27_v15 = vld [vmem:[%s483_s0 + $0x38] sm:$0x3f] }
   0x5   :  { %346 = vmatprep.subr.bf16.mxu0 %v364_v0  ;;  %v29_v16 = vsel %vm28_vm1, %v20_v7, 0.0  ;;  %v36_v17 = vsel %vm28_vm1, %v21_v8, 0.0  ;;  %v43_v18 = vsel %vm28_vm1, %v22_v9, 0.0  ;;  %v50_v19 = vsel %vm28_vm1, %v23_v10, 0.0 }
   0x6   :  { %v30_v20 = vrot.slane %v29_v16, 4  ;;  %v37_v21 = vrot.slane %v36_v17, 4  ;;  %v44_v22 = vrot.slane %v43_v18, 4  ;;  %v51_v23 = vrot.slane %v50_v19, 4 }
   0x7   :  { %v57_v24 = vsel %vm28_vm1, %v24_v11, 0.0  ;;  %v64_v25 = vsel %vm28_vm1, %v25_v13, 0.0  ;;  %v71_v26 = vsel %vm28_vm1, %v26_v14, 0.0  ;;  %v78_v27 = vsel %vm28_vm1, %v27_v15, 0.0  ;;  %v200_v13 = vld [vmem:[%s484_s3] sm:$0xff]  ;;  %v201_v14 = vld [vmem:[%s484_s3 + $0x8] sm:$0xff] }
   0x8   :  { %348 = vmatpush3.bf16.msra.mxu0 %v347_v12  ;;  %v31_v28 = vadd.f32 %v30_v20, %v29_v16  ;;  %v38_v29 = vadd.f32 %v37_v21, %v36_v17  ;;  %v45_v30 = vadd.f32 %v44_v22, %v43_v18  ;;  %v52_v31 = vadd.f32 %v51_v23, %v50_v19  ;;  %v202_v18 = vld [vmem:[%s484_s3 + $0x10] sm:$0xff]  ;;  %v203_v19 = vld [vmem:[%s484_s3 + $0x18] sm:$0xff] }
   0x9   :  { %v58_v32 = vrot.slane %v57_v24, 4  ;;  %v65_v33 = vrot.slane %v64_v25, 4  ;;  %v72_v34 = vrot.slane %v71_v26, 4  ;;  %v79_v35 = vrot.slane %v78_v27, 4 }
   0xa   :  { %v32_v36 = vrot.slane %v31_v28, 2  ;;  %v39_v37 = vrot.slane %v38_v29, 2  ;;  %v46_v38 = vrot.slane %v45_v30, 2  ;;  %v53_v39 = vrot.slane %v52_v31, 2 }
   0xb   :  { %v59_v40 = vadd.f32 %v58_v32, %v57_v24  ;;  %v66_v41 = vadd.f32 %v65_v33, %v64_v25  ;;  %v73_v42 = vadd.f32 %v72_v34, %v71_v26  ;;  %v80_v43 = vadd.f32 %v79_v35, %v78_v27  ;;  %v206_v33 = vld [vmem:[%s484_s3 + $0x30] sm:$0xff]  ;;  %v207_v34 = vld [vmem:[%s484_s3 + $0x38] sm:$0xff] }
   0xc   :  { %v33_v44 = vadd.f32 %v32_v36, %v31_v28  ;;  %v40_v45 = vadd.f32 %v39_v37, %v38_v29  ;;  %v47_v46 = vadd.f32 %v46_v38, %v45_v30  ;;  %v54_v47 = vadd.f32 %v53_v39, %v52_v31  ;;  %v204_v28 = vld [vmem:[%s484_s3 + $0x20] sm:$0xff]  ;;  %v205_v29 = vld [vmem:[%s484_s3 + $0x28] sm:$0xff] }
   0xd   :  { %v60_v48 = vrot.slane %v59_v40, 2  ;;  %v67_v49 = vrot.slane %v66_v41, 2  ;;  %v74_v50 = vrot.slane %v73_v42, 2  ;;  %v81_v51 = vrot.slane %v80_v43, 2  ;;  %v295_v36 = vld [vmem:[%s485_s2] ss:$0 sm:$0xff] }
   0xe   :  { %v34_v52 = vrot.slane %v33_v44, 1  ;;  %v41_v53 = vrot.slane %v40_v45, 1  ;;  %v48_v54 = vrot.slane %v47_v46, 1  ;;  %v55_v55 = vrot.slane %v54_v47, 1 }
   0xf   :  { %v61_v56 = vadd.f32 %v60_v48, %v59_v40  ;;  %v68_v57 = vadd.f32 %v67_v49, %v66_v41  ;;  %v75_v58 = vadd.f32 %v74_v50, %v73_v42  ;;  %v82_v59 = vadd.f32 %v81_v51, %v80_v43 }
  0x10   :  { %v35_v60 = vadd.f32 %v34_v52, %v33_v44  ;;  %v42_v61 = vadd.f32 %v41_v53, %v40_v45  ;;  %v49_v62 = vadd.f32 %v48_v54, %v47_v46  ;;  %v56_v63 = vadd.f32 %v55_v55, %v54_v47 }
  0x11   :  { %v62_v1 = vrot.slane %v61_v56, 1  ;;  %v69_v2 = vrot.slane %v68_v57, 1  ;;  %v76_v3 = vrot.slane %v75_v58, 1  ;;  %v83_v4 = vrot.slane %v82_v59, 1 }
  0x12   :  { %v85_v5 = vmul.f32 0.125, %v35_v60  ;;  %v86_v6 = vmul.f32 0.125, %v42_v61  ;;  %v87_v7 = vmul.f32 0.125, %v49_v62  ;;  %v88_v8 = vmul.f32 0.125, %v56_v63 }
  0x13   :  { %v63_v9 = vadd.f32 %v62_v1, %v61_v56  ;;  %v70_v10 = vadd.f32 %v69_v2, %v68_v57  ;;  %v77_v11 = vadd.f32 %v76_v3, %v75_v58  ;;  %v84_v12 = vadd.f32 %v83_v4, %v82_v59 }
  0x14   :  { %v113_v15 = vsel %vm112_vm2, %v86_v6, %v85_v5  ;;  %vm120_vm6 = vcmask 1045509   ;;  %v350_v22 = vpack.c.bf16 %v201_v14, %v200_v13  ;;  %vm122_vm7 = vcmask 1046534  }
  0x15   :  { %v89_v16 = vmul.f32 0.125, %v63_v9  ;;  %v90_v17 = vmul.f32 0.125, %v70_v10  ;;  %v91_v20 = vmul.f32 0.125, %v77_v11  ;;  %v115_v21 = vsel %vm114_vm3, %v87_v7, %v113_v15 }
  0x16   :  { %v92_v23 = vmul.f32 0.125, %v84_v12  ;;  %v117_v24 = vsel %vm116_vm4, %v88_v8, %v115_v21  ;;  %vm124_vm8 = vcmask 1047559   ;;  %351 = vmatpush3.bf16.msra.mxu1 %v350_v22  ;;  %v353_v26 = vpack.c.bf16 %v203_v19, %v202_v18 }
  0x17   :  { %v119_v25 = vsel %vm118_vm5, %v89_v16, %v117_v24  ;;  %vm126_vm9 = vcmask 261120   ;;  %352 = vmatprep.subr.bf16.mxu1 %v364_v0  ;;  %v356_v32 = vpack.c.bf16 %v205_v29, %v204_v28  ;;  %v359_v35 = vpack.c.bf16 %v207_v34, %v206_v33 }
  0x18   :  { %v121_v27 = vsel %vm120_vm6, %v90_v17, %v119_v25  ;;  %vm215_vm10 = vcmask 523264  }
  0x19   :  { %v123_v30 = vsel %vm122_vm7, %v91_v20, %v121_v27 }
  0x1a   :  { %v125_v31 = vsel %vm124_vm8, %v92_v23, %v123_v30  ;;  %354 = vmatpush3.bf16.msra.mxu1 %v353_v26 }
  0x1b   :  { %322 = vmatmul.mubr.msk.f32.vlgmr.msra.gmra.mrb[0].mxu0 %vm126_vm9, %v125_v31  ;;  %355 = vmatprep.subr.bf16.mxu1 %v364_v0 }
  0x1e   :  { %357 = vmatpush3.bf16.msra.mxu1 %v356_v32 }
  0x1f   :  { %358 = vmatprep.subr.bf16.mxu1 %v364_v0  ;;  %v297_v0 = vld [vmem:[%s486_s4] ss:$0 sm:$0xff] }
  0x22   :  { %360 = vmatpush3.bf16.msra.mxu1 %v359_v35 }
  0xee   :  { %v195_v37 = vpop.f32.mrb[0].mxu0 }
  0xef   :  { %v196_v38 = vadd.f32 %v295_v36, %v195_v37  ;;  %v323_v39 = vpop.f32.mrb[1].mxu0 }
  0xf1   :  { %v199_v40 = vmax.f32 %v196_v38, 0.0 }
  0xf3   :  { %341 = vmatmul.mubr.msk.f32.vlgmr.msra.gmra.mrb[0].mxu1 %vm215_vm10, %v199_v40 }
 0x1c6   :  { %v285_v41 = vpop.f32.mrb[0].mxu1 }
 0x1c7   :  { %v286_v42 = vadd.f32 %v297_v0, %v285_v41  ;;  %v342_v43 = vpop.f32.mrb[1].mxu1 }
 0x1c9   :  { %v289_v44 = vmax.f32 %v286_v42, 0.0 }
 0x1cb   :  { %290 = vst [vmem:[%s487_s5] sm:$0xff] %v289_v44 }

</bundles_post_ra>
